<compile_context>
chip_gen: v6e
topology: v6e:2x2x1
jax: 0.10.0
libtpu: 0.0.40
codegen_flags: <defaults>
</compile_context>

<pallas_src>
import jax
import jax.numpy as jnp
from jax.experimental import pallas as pl
from jax.experimental.pallas import tpu as pltpu

IGNORE_INDEX = -100


def _cdiv(a, b):
    return -(-a // b)


def _vmem_budget_bytes():
    try:
        cap = pltpu.get_tpu_info().vmem_capacity_bytes
    except Exception:
        cap = 64 * 1024 * 1024          # conservative (v7x-sized) fallback
    return int(cap) * 3 // 4             # ~96 MiB on v5e/v6e, ~48 MiB on v7x


def _pick_tiles(s_pred, vocab, itemsize, budget_bytes):
    """Pick (seq_tile, vocab_chunk, vocab_tiles) for the VMEM budget."""
    granule = max(8, 32 // max(itemsize, 1))    # min sublane tile: 8 f32 / 16 bf16 / 32 int8
    # Vocab chunking: full vocab for small/medium V; 4096-lane chunks for huge V so the
    # sequence tile stays large (online softmax handles the cross-chunk reduction).
    if vocab <= 8192:
        vc, v_tiles = vocab, 1
    else:
        vc = 4096                               # multiple of 128
        v_tiles = _cdiv(vocab, vc)
    # Per-row VMEM per grid step: 2x double-buffered input chunk + ~2 f32 temporaries.
    bytes_per_row = vc * (2 * itemsize + 8) + 64
    ts = int(budget_bytes // max(bytes_per_row, 1))
    ts = min(max(ts, granule), 1024)
    full = granule * _cdiv(s_pred, granule)     # one block covering the whole shifted seq
    if ts >= full:
        ts = full
    elif ts >= 32:
        ts = (ts // 32) * 32
    else:
        ts = max((ts // granule) * granule, granule)
    return ts, vc, v_tiles


def _make_ce_kernel(vocab, vc, mask_vocab_tail):
    def kernel(logits_ref, labels_ref, out_ref, m_acc, se_acc, pick_acc):
        v = pl.program_id(2)

        @pl.when(v == 0)
        def _():
            m_acc[...] = jnp.full(m_acc.shape, -jnp.inf, dtype=jnp.float32)
            se_acc[...] = jnp.zeros(se_acc.shape, dtype=jnp.float32)
            pick_acc[...] = jnp.zeros(pick_acc.shape, dtype=jnp.float32)

        x = logits_ref[...].astype(jnp.float32)       # (ts, vc)
        labels = labels_ref[...]                      # (ts, 1) int32

        # Global column indices of this vocab chunk: a single (1, vc) iota broadcast
        # against the (ts, 1) label column (no full-tile iota).
        col = jax.lax.broadcasted_iota(jnp.int32, (1, vc), 1) + v * vc
        if mask_vocab_tail:
            # Ragged vocab tail: columns >= vocab must not affect max / exp-sum.
            x = jnp.where(col < vocab, x, -jnp.inf)

        # Online (flash-style) softmax over vocab chunks, per row.
        m_old = m_acc[...]
        m_new = jnp.maximum(m_old, jnp.max(x, axis=-1, keepdims=True))   # (ts, 1)
        alpha = jnp.exp(m_old - m_new)                                   # (ts, 1) cheap
        e = jnp.exp(x - m_new)                                           # (ts, vc) EUP
        se_acc[...] = alpha * se_acc[...] + jnp.sum(e, axis=-1, keepdims=True)
        # The label lands in exactly one vocab chunk, so plain accumulation picks it.
        pick_acc[...] += jnp.sum(jnp.where(col == labels, x, 0.0),
                                 axis=-1, keepdims=True)
        m_acc[...] = m_new

        @pl.when(v == pl.num_programs(2) - 1)
        def _():
            valid = labels != IGNORE_INDEX
            lse = m_acc[...] + jnp.log(se_acc[...])                      # (ts, 1)
            # Masked rows (IGNORE_INDEX labels, the shifted-out final position, ragged
            # sequence-tail pad rows) contribute exactly 0 even if their logits rows
            # held garbage: the select discards NaN/Inf per row.
            out_ref[...] = jnp.where(valid, lse - pick_acc[...], 0.0)

    return kernel


@jax.jit
def gpt_lm_loss(logits, labels):
    """logits: (B, S, V) float; labels: (B, S) int.  Returns scalar mean CE loss (float32).

    Equivalent to nn.CrossEntropyLoss(ignore_index=-100) applied to
    (logits[:, :-1, :].reshape(-1, V), labels[:, 1:].reshape(-1)).
    Returns NaN if every label is ignored (same as PyTorch).
    """
    B, S, V = logits.shape
    if S < 2:
        return jnp.array(jnp.nan, dtype=jnp.float32)

    s_pred = S - 1
    itemsize = jnp.dtype(logits.dtype).itemsize
    budget = _vmem_budget_bytes()
    ts, vc, v_tiles = _pick_tiles(s_pred, V, itemsize, budget)
    s_tiles = _cdiv(s_pred, ts)
    padded = s_tiles * ts

    # Only the (tiny) labels are shifted / padded; padded slots get IGNORE_INDEX.
    shift_labels = labels[:, 1:].astype(jnp.int32)
    n_valid = jnp.sum((shift_labels != IGNORE_INDEX).astype(jnp.float32))
    shift_labels = jnp.pad(shift_labels, ((0, 0), (0, padded - s_pred)),
                           constant_values=IGNORE_INDEX)[..., None]      # (B, padded, 1)

    kernel = _make_ce_kernel(V, vc, mask_vocab_tail=(V % vc != 0))

    per_tok = pl.pallas_call(
        kernel,
        out_shape=jax.ShapeDtypeStruct((B, padded, 1), jnp.float32),
        grid_spec=pltpu.PrefetchScalarGridSpec(
            num_scalar_prefetch=0,
            grid=(B, s_tiles, v_tiles),           # vocab reduction axis last
            in_specs=[
                # logits straight from HBM, one pass, no wrapper-side copies
                pl.BlockSpec((pl.Squeezed(), ts, vc), lambda b, s, v: (b, s, v)),
                pl.BlockSpec((pl.Squeezed(), ts, 1), lambda b, s, v: (b, s, 0)),
            ],
            out_specs=pl.BlockSpec((pl.Squeezed(), ts, 1), lambda b, s, v: (b, s, 0)),
            scratch_shapes=[
                pltpu.VMEM((ts, 1), jnp.float32),    # running row max
                pltpu.VMEM((ts, 1), jnp.float32),    # running exp-sum
                pltpu.VMEM((ts, 1), jnp.float32),    # picked label logit
            ],
        ),
        compiler_params=pltpu.CompilerParams(
            # batch AND sequence-tile axes parallel -> both v7x TCs busy even with B == 1
            dimension_semantics=("parallel", "parallel", "arbitrary"),
            vmem_limit_bytes=budget,
        ),
        cost_estimate=pl.CostEstimate(
            flops=6 * B * s_pred * V,
            transcendentals=B * s_pred * V,
            bytes_accessed=B * S * V * itemsize + B * padded * (4 + 4 + 4),
        ),
    )(logits, shift_labels)

    # Tiny f32 combine (PyTorch reduces in f32); 0/0 -> NaN when every label is ignored.
    return jnp.sum(per_tok) / n_valid


def _reference_loss(logits, labels):
    """Pure-JAX reference matching nn.CrossEntropyLoss(ignore_index=-100)."""
    B, S, V = logits.shape
    sl = logits[:, :-1, :].reshape(-1, V).astype(jnp.float32)
    lb = labels[:, 1:].reshape(-1)
    lse = jax.scipy.special.logsumexp(sl, axis=-1)
    picked = jnp.take_along_axis(sl, jnp.clip(lb, 0)[:, None], axis=-1)[:, 0]
    valid = lb != IGNORE_INDEX
    per = jnp.where(valid, lse - picked, 0.0)
    return jnp.sum(per) / jnp.sum(valid.astype(jnp.float32))


if __name__ == "__main__":
    key = jax.random.PRNGKey(0)
    B, S, V = 2, 8, 128
    k1, k2 = jax.random.split(key)
    logits = jax.random.normal(k1, (B, S, V), dtype=jnp.float32)
    labels = jax.random.randint(k2, (B, S), 0, V, dtype=jnp.int32)
    # sprinkle some ignored positions
    labels = labels.at[0, 3].set(IGNORE_INDEX).at[1, 5].set(IGNORE_INDEX)

    out = gpt_lm_loss(logits, labels)
    jax.block_until_ready(out)

    ref = _reference_loss(logits, labels)
    assert jnp.allclose(out, ref, atol=1e-5, rtol=1e-5), (out, ref)

    print("KERNEL_OK")
</pallas_src>

<mosaic_0001>
module attributes {stable_mosaic.version = 11 : i64} {
  func.func @kernel(%arg0: i32, %arg1: i32, %arg2: i32, %arg3: memref<1x8x128xf32, #tpu.memory_space<vmem>>, %arg4: memref<1x8x1xi32, #tpu.memory_space<vmem>>, %arg5: memref<1x8x1xf32, #tpu.memory_space<vmem>>, %arg6: memref<8x1xf32, #tpu.memory_space<vmem>>, %arg7: memref<8x1xf32, #tpu.memory_space<vmem>>, %arg8: memref<8x1xf32, #tpu.memory_space<vmem>>) attributes {dimension_semantics = [#tpu.dimension_semantics<parallel>, #tpu.dimension_semantics<parallel>, #tpu.dimension_semantics<arbitrary>], iteration_bounds = array<i64: 2, 1, 1>, scalar_prefetch = 0 : i64, scratch_operands = 3 : i64, tpu.core_type = #tpu.core_type<tc>, window_params = [{transform_indices = @transform_0, window_bounds = array<i64: 1, 8, 128>}, {transform_indices = @transform_1, window_bounds = array<i64: 1, 8, 1>}, {transform_indices = @transform_2, window_bounds = array<i64: 1, 8, 1>}]} {
    %c0_i32 = arith.constant 0 : i32
    %0 = arith.cmpi eq, %arg2, %c0_i32 : i32
    %1 = arith.extui %0 : i1 to i32
    %c0_i32_0 = arith.constant 0 : i32
    %2 = arith.cmpi ne, %1, %c0_i32_0 : i32
    scf.if %2 {
      %cst_23 = arith.constant 0xFF800000 : f32
      %40 = vector.broadcast %cst_23 : f32 to vector<8x1xf32>
      %c0_24 = arith.constant 0 : index
      %c0_25 = arith.constant 0 : index
      %41 = vector.load %arg6[%c0_24, %c0_25] : memref<8x1xf32, #tpu.memory_space<vmem>>, vector<8x1xf32>
      tpu.vector_store %arg6[%c0_24, %c0_25], %40 {strides = array<i32>} : memref<8x1xf32, #tpu.memory_space<vmem>>, vector<8x1xf32>,
      %cst_26 = arith.constant 0.000000e+00 : f32
      %42 = vector.broadcast %cst_26 : f32 to vector<8x1xf32>
      %c0_27 = arith.constant 0 : index
      %c0_28 = arith.constant 0 : index
      %43 = vector.load %arg7[%c0_27, %c0_28] : memref<8x1xf32, #tpu.memory_space<vmem>>, vector<8x1xf32>
      tpu.vector_store %arg7[%c0_27, %c0_28], %42 {strides = array<i32>} : memref<8x1xf32, #tpu.memory_space<vmem>>, vector<8x1xf32>,
      %cst_29 = arith.constant 0.000000e+00 : f32
      %44 = vector.broadcast %cst_29 : f32 to vector<8x1xf32>
      %c0_30 = arith.constant 0 : index
      %c0_31 = arith.constant 0 : index
      %45 = vector.load %arg8[%c0_30, %c0_31] : memref<8x1xf32, #tpu.memory_space<vmem>>, vector<8x1xf32>
      tpu.vector_store %arg8[%c0_30, %c0_31], %44 {strides = array<i32>} : memref<8x1xf32, #tpu.memory_space<vmem>>, vector<8x1xf32>,
    } else {
    }
    %c0 = arith.constant 0 : index
    %c0_1 = arith.constant 0 : index
    %c0_2 = arith.constant 0 : index
    %3 = vector.load %arg3[%c0, %c0_1, %c0_2] : memref<1x8x128xf32, #tpu.memory_space<vmem>>, vector<1x8x128xf32>
    %4 = vector.shape_cast %3 : vector<1x8x128xf32> to vector<8x128xf32>
    %c0_3 = arith.constant 0 : index
    %c0_4 = arith.constant 0 : index
    %c0_5 = arith.constant 0 : index
    %5 = vector.load %arg4[%c0_3, %c0_4, %c0_5] : memref<1x8x1xi32, #tpu.memory_space<vmem>>, vector<1x8x1xi32>
    %6 = vector.shape_cast %5 : vector<1x8x1xi32> to vector<8x1xi32>
    %7 = tpu.iota {dimensions = array<i32: 1>} : vector<1x128xi32>
    %c128_i32 = arith.constant 128 : i32
    %8 = arith.muli %arg2, %c128_i32 : i32
    %9 = vector.broadcast %8 : i32 to vector<1x128xi32>
    %10 = arith.addi %7, %9 : vector<1x128xi32>
    %c0_6 = arith.constant 0 : index
    %c0_7 = arith.constant 0 : index
    %11 = vector.load %arg6[%c0_6, %c0_7] : memref<8x1xf32, #tpu.memory_space<vmem>>, vector<8x1xf32>
    %cst = arith.constant dense<0xFF800000> : vector<8xf32>
    %12 = vector.multi_reduction <maximumf>, %4, %cst [1] : vector<8x128xf32> to vector<8xf32>
    %13 = vector.shape_cast %12 : vector<8xf32> to vector<8x1xf32>
    %14 = arith.maximumf %11, %13 : vector<8x1xf32>
    %15 = arith.subf %11, %14 : vector<8x1xf32>
    %16 = math.exp %15 : vector<8x1xf32>
    %17 = vector.broadcast %14 : vector<8x1xf32> to vector<8x128xf32>
    %18 = arith.subf %4, %17 : vector<8x128xf32>
    %19 = math.exp %18 : vector<8x128xf32>
    %c0_8 = arith.constant 0 : index
    %c0_9 = arith.constant 0 : index
    %20 = vector.load %arg7[%c0_8, %c0_9] : memref<8x1xf32, #tpu.memory_space<vmem>>, vector<8x1xf32>
    %21 = arith.mulf %16, %20 : vector<8x1xf32>
    %cst_10 = arith.constant dense<0.000000e+00> : vector<8xf32>
    %22 = vector.multi_reduction <add>, %19, %cst_10 [1] : vector<8x128xf32> to vector<8xf32>
    %23 = vector.shape_cast %22 : vector<8xf32> to vector<8x1xf32>
    %24 = arith.addf %21, %23 : vector<8x1xf32>
    %c0_11 = arith.constant 0 : index
    %c0_12 = arith.constant 0 : index
    %25 = vector.load %arg7[%c0_11, %c0_12] : memref<8x1xf32, #tpu.memory_space<vmem>>, vector<8x1xf32>
    tpu.vector_store %arg7[%c0_11, %c0_12], %24 {strides = array<i32>} : memref<8x1xf32, #tpu.memory_space<vmem>>, vector<8x1xf32>,
    %c0_13 = arith.constant 0 : index
    %c0_14 = arith.constant 0 : index
    %26 = vector.load %arg8[%c0_13, %c0_14] : memref<8x1xf32, #tpu.memory_space<vmem>>, vector<8x1xf32>
    %27 = vector.broadcast %10 : vector<1x128xi32> to vector<8x128xi32>
    %28 = vector.broadcast %6 : vector<8x1xi32> to vector<8x128xi32>
    %29 = arith.cmpi eq, %27, %28 : vector<8x128xi32>
    %cst_15 = arith.constant 0.000000e+00 : f32
    %30 = vector.broadcast %cst_15 : f32 to vector<8x128xf32>
    %31 = arith.select %29, %4, %30 : vector<8x128xi1>, vector<8x128xf32>
    %cst_16 = arith.constant dense<0.000000e+00> : vector<8xf32>
    %32 = vector.multi_reduction <add>, %31, %cst_16 [1] : vector<8x128xf32> to vector<8xf32>
    %33 = vector.shape_cast %32 : vector<8xf32> to vector<8x1xf32>
    %34 = arith.addf %26, %33 : vector<8x1xf32>
    %c0_17 = arith.constant 0 : index
    %c0_18 = arith.constant 0 : index
    %35 = vector.load %arg8[%c0_17, %c0_18] : memref<8x1xf32, #tpu.memory_space<vmem>>, vector<8x1xf32>
    tpu.vector_store %arg8[%c0_17, %c0_18], %34 {strides = array<i32>} : memref<8x1xf32, #tpu.memory_space<vmem>>, vector<8x1xf32>,
    %c0_19 = arith.constant 0 : index
    %c0_20 = arith.constant 0 : index
    %36 = vector.load %arg6[%c0_19, %c0_20] : memref<8x1xf32, #tpu.memory_space<vmem>>, vector<8x1xf32>
    tpu.vector_store %arg6[%c0_19, %c0_20], %14 {strides = array<i32>} : memref<8x1xf32, #tpu.memory_space<vmem>>, vector<8x1xf32>,
    %c0_i32_21 = arith.constant 0 : i32
    %37 = arith.cmpi eq, %arg2, %c0_i32_21 : i32
    %38 = arith.extui %37 : i1 to i32
    %c0_i32_22 = arith.constant 0 : i32
    %39 = arith.cmpi ne, %38, %c0_i32_22 : i32
    scf.if %39 {
      %c-100_i32 = arith.constant -100 : i32
      %40 = vector.broadcast %c-100_i32 : i32 to vector<8x1xi32>
      %41 = arith.cmpi ne, %6, %40 : vector<8x1xi32>
      %c0_23 = arith.constant 0 : index
      %c0_24 = arith.constant 0 : index
      %42 = vector.load %arg6[%c0_23, %c0_24] : memref<8x1xf32, #tpu.memory_space<vmem>>, vector<8x1xf32>
      %c0_25 = arith.constant 0 : index
      %c0_26 = arith.constant 0 : index
      %43 = vector.load %arg7[%c0_25, %c0_26] : memref<8x1xf32, #tpu.memory_space<vmem>>, vector<8x1xf32>
      %44 = math.log %43 : vector<8x1xf32>
      %45 = arith.addf %42, %44 : vector<8x1xf32>
      %c0_27 = arith.constant 0 : index
      %c0_28 = arith.constant 0 : index
      %46 = vector.load %arg8[%c0_27, %c0_28] : memref<8x1xf32, #tpu.memory_space<vmem>>, vector<8x1xf32>
      %47 = arith.subf %45, %46 : vector<8x1xf32>
      %cst_29 = arith.constant 0.000000e+00 : f32
      %48 = vector.broadcast %cst_29 : f32 to vector<8x1xf32>
      %49 = arith.select %41, %47, %48 : vector<8x1xi1>, vector<8x1xf32>
      %c0_30 = arith.constant 0 : index
      %c0_31 = arith.constant 0 : index
      %c0_32 = arith.constant 0 : index
      %50 = vector.load %arg5[%c0_30, %c0_31, %c0_32] : memref<1x8x1xf32, #tpu.memory_space<vmem>>, vector<1x8x1xf32>
      %51 = vector.shape_cast %50 : vector<1x8x1xf32> to vector<8x1xf32>
      %52 = vector.shape_cast %49 : vector<8x1xf32> to vector<1x8x1xf32>
      tpu.vector_store %arg5[%c0_30, %c0_31, %c0_32], %52 {strides = array<i32>} : memref<1x8x1xf32, #tpu.memory_space<vmem>>, vector<1x8x1xf32>,
    } else {
    }
    return
  }
  func.func @transform_0(%arg0: i32, %arg1: i32, %arg2: i32) -> (i32, i32, i32) {
    %c0_i32 = arith.constant 0 : i32
    return %arg0, %arg1, %arg2 : i32, i32, i32
  }
  func.func @transform_1(%arg0: i32, %arg1: i32, %arg2: i32) -> (i32, i32, i32) {
    %c0_i32 = arith.constant 0 : i32
    %c0_i32_0 = arith.constant 0 : i32
    return %arg0, %arg1, %c0_i32 : i32, i32, i32
  }
  func.func @transform_2(%arg0: i32, %arg1: i32, %arg2: i32) -> (i32, i32, i32) {
    %c0_i32 = arith.constant 0 : i32
    %c0_i32_0 = arith.constant 0 : i32
    return %arg0, %arg1, %c0_i32 : i32, i32, i32
  }
}

</mosaic_0001>

<bundles_post_ra>
// kernel: gpt_lm_loss.1
= control target key start
LH: loop header
LB: loop body
LE: loop exit
PB: predicated region body
PF: predicated region fallthrough
CT: control target
= control target key end

     0   :  { %s459_s9 = smov 0   ;;  %s461_s10 = smov 0   ;;  %s507_s0 = inlined_call_operand.vmem [shape: f32[2,8,128], index: 0, kind: input, shape index: {}]   ;;  %s508_s1 = inlined_call_operand.vmem [shape: s32[2,8,1], index: 1, kind: input, shape index: {}]   ;;  %s509_s2 = inlined_call_operand.vmem [shape: f32[2,8,1], index: 2, kind: output, shape index: {}]  }
   0x1   :  { %s463_s11 = smov 0  }
   0x2 LB: > { %s31_s12 = sadd.s32 1, %s435_s10  ;;  %p376_p0 = scmp.ge.s32.totalorder %s439_s11, 1  ;;  %s439_s11 = sphi %s463_s11, %s12_s11   ;;  %s435_s10 = sphi %s461_s10, %s511_s10   ;;  %s431_s9 = sphi %s459_s9, %s510_s9  }
   0x3   : > { %p33_p1 = scmp.ge.s32.totalorder %s31_s12, 2  ;;  %p156_p2 = scmp.lt.s32.totalorder %s439_s11, 3 }
   0x5   : > { %s513_s12 = smov (%p33_p1, %s31_s12), 0  ;;  %p157_p3 = pnand %p376_p0, %p156_p2 }
   0x6   : > { %p192_p4 = scmp.lt.s32.totalorder (!%p157_p3), %s431_s9, 1 }
   0x7   : > { %160 = sbr.rel (%p157_p3) target bundleno = 468 (0x1d4), region = 28 }
   0xc   : > { %vm220_vm0 = vcmask 7168   ;;  %v441_v0 = vmov -inf   ;;  %s515_s9 = smov (!%p192_p4, %s431_s9), 1  ;;  %v442_v2 = vmov 0   ;;  %v443_v4 = vmov 0.0  }
   0xd   : > { %221 = vst.msk [vmem:[#allocation2] sm:$0xff] %vm220_vm0, %v441_v0  ;;  %s478_s13 = sshll.u32 %s515_s9, 3  ;;  %409 = vset.pattern.permute.xlu0 %v442_v2  ;;  %410 = vset.pattern.permute.xlu1 %v442_v2  ;;  %222 = vst.msk [vmem:[#allocation3] sm:$0xff] %vm220_vm0, %v443_v4  ;;  %v226_v12 = vlaneseq }
   0xe   : > { %s201_s16 = scalar_lea.vmem %s507_s0, %s478_s13  ;;  %s208_s19 = scalar_lea.vmem %s508_s1, %s478_s13  ;;  %223 = vst.msk [vmem:[#allocation4] sm:$0xff] %vm220_vm0, %v443_v4 }
   0xf   : > { %v224_v1 = vld [vmem:[%s201_s16] sm:$0xff]  ;;  %v227_v13 = vand.u32 127, %v226_v12  ;;  %s215_s22 = scalar_lea.vmem %s509_s2, %s478_s13 }
  0x10   : > { %232 = vmax.xlane.f32.xlu0 %v224_v1  ;;  %v225_v3 = vld [vmem:[%s208_s19] sm:$0xff] }
  0x11   : > { %255 = vperm.xlu1 %410, %v225_v3   ;;  %vm267_vm2 = vcmp.ne.s32.totalorder %v225_v3, 4294967196 }
  0x14   : > { %v231_v5 = vld [vmem:[#allocation2] sm:$0xff]  ;;  %v246_v19 = vld [vmem:[#allocation3] sm:$0xff] }
  0x15   : > { %v253_v23 = vld [vmem:[#allocation4] sm:$0xff] }
  0x8c   : > { %v256_v14 = vpop.permute.xlu1 %255 }
  0x8d   : > { %vm257_vm1 = vcmp.eq.s32.totalorder %v227_v13, %v256_v14 }
  0x8e   : > { %v258_v16 = vsel %vm257_vm1, %v224_v1, 0.0 }
  0x99   : > { %v233_v6 = vpop.xlane.xlu0 %232 }
  0x9a   : > { %v234_v7 = vmax.f32 %v231_v5, %v233_v6 }
  0x9c   : > { %v235_v8 = vsub.f32 %v231_v5, %v234_v7  ;;  %263 = vst.msk [vmem:[#allocation2] sm:$0xff] %vm220_vm0, %v234_v7  ;;  %240 = vperm.xlu0 %409, %v234_v7  }
  0x9e   : > { %v236_v17 = vmul.f32 1.442695, %v235_v8 }
  0xa3   : > { %v268_v29 = vld [vmem:[#allocation2] sm:$0xff] }
 0x117   : > { %v241_v9 = vpop.permute.xlu0 %240 }
 0x118   : > { %v243_v10 = vsub.f32 %v224_v1, %v241_v9 }
 0x11a   : > { %v244_v11 = vmul.f32 1.442695, %v243_v10 }
 0x11c   : > { %411 = vpow2.f32 %v244_v11 }
 0x11d   : > { %413 = vpow2.f32 %v236_v17 }
 0x129   : > { %v412_v15 = vpop.eup %411 }
 0x12a   : > { %248 = vadd.xlane.f32.xlu1 %v412_v15  ;;  %v414_v18 = vpop.eup %413 }
 0x12b   : > { %v247_v20 = vmul.f32 %v414_v18, %v246_v19 }
 0x12e   : > { %259 = vadd.xlane.f32.xlu1 %v258_v16 }
 0x1b3   : > { %v249_v21 = vpop.xlane.xlu1 %248 }
 0x1b4   : > { %v250_v22 = vadd.f32 %v249_v21, %v247_v20 }
 0x1b6   : > { %252 = vst.msk [vmem:[#allocation3] sm:$0xff] %vm220_vm0, %v250_v22 }
 0x1b7   : > { %v260_v24 = vpop.xlane.xlu1 %259 }
 0x1b8   : > { %v261_v25 = vadd.f32 %v260_v24, %v253_v23 }
 0x1ba   : > { %262 = vst.msk [vmem:[#allocation4] sm:$0xff] %vm220_vm0, %v261_v25 }
 0x1bd   : > { %v269_v26 = vld [vmem:[#allocation3] sm:$0xff] }
 0x1be   : > { %415 = vlog2.f32 %v269_v26 }
 0x1c1   : > { %v273_v30 = vld [vmem:[#allocation4] sm:$0xff] }
 0x1cb   : > { %v416_v27 = vpop.eup %415 }
 0x1cc   : > { %v271_v28 = vmul.f32 0.6931472, %v416_v27 }
 0x1ce   : > { %v272_v31 = vadd.f32 %v271_v28, %v268_v29 }
 0x1d0   : > { %v274_v32 = vsub.f32 %v272_v31, %v273_v30 }
 0x1d2   : > { %v275_v33 = vsel %vm267_vm2, %v274_v32, 0.0 }
 0x1d3   : > { %276 = vst.msk [vmem:[%s215_s22] sm:$0xff] %vm220_vm0, %v275_v33 }
 0x1d4 PF: > { %s12_s11 = sadd.s32 1, %s439_s11   ;;  %s510_s9 = smov %s435_s10 }
 0x1d5   : > { %p9_p5 = scmp.ge.s32.totalorder %s12_s11, 4   ;;  %s511_s10 = smov %s513_s12 }
 0x1d7   :  { %11 = sbr.rel (!%p9_p5) target bundleno = 2 (0x2), region = 69 }

</bundles_post_ra>
